<compile_context>
chip_gen: v7x
topology: tpu7x:2x2x1
jax: 0.10.0
libtpu: 0.0.40
codegen_flags: <defaults>
</compile_context>

<pallas_src>
import functools

import jax
import jax.numpy as jnp
from jax.experimental import pallas as pl
from jax.experimental.pallas import tpu as pltpu


def _fi_partial_kernel(logits_ref, labels_ref, mask_ref, out_ref, *, total_rows):
    """Per-tile partial sums. Writes one (1, 128) row per grid step:
       lane 0: sum_i mask_i * ce_p_i
       lane 1: sum_i (~mask_i) * ce_n_i
       lane 2: #{~mask_i}          (valid rows of this tile only)
    """
    logits = logits_ref[...].astype(jnp.float32)      # (TB, C) f32 compute
    labels = labels_ref[...]                          # (TB, 1) int32
    m = mask_ref[...].astype(jnp.float32)             # (TB, 1) in {0., 1.}

    tb, c = logits.shape

    if total_rows % tb == 0:
        valid = jnp.ones((tb, 1), jnp.float32)
    else:
        # Last tile is partial: sanitize padded rows so garbage VMEM can't poison sums.
        row = jax.lax.broadcasted_iota(jnp.int32, (tb, 1), 0) + pl.program_id(0) * tb
        in_bounds = row < total_rows
        valid = in_bounds.astype(jnp.float32)
        logits = jnp.where(in_bounds, logits, 0.0)
        m = m * valid

    # logits[i, label_i] via masked select (no one-hot materialization)
    col = jax.lax.broadcasted_iota(jnp.int32, (tb, c), 1)
    logit_y = jnp.sum(jnp.where(col == labels, logits, 0.0), axis=1, keepdims=True)   # (TB, 1)

    # numerically-stable logsumexp over classes
    mx = jnp.max(logits, axis=1, keepdims=True)
    lse = mx + jnp.log(jnp.sum(jnp.exp(logits - mx), axis=1, keepdims=True))          # (TB, 1)
    sum_logits = jnp.sum(logits, axis=1, keepdims=True)                               # (TB, 1)

    ce_p = lse - logit_y                                           # standard CE
    ce_n = -(sum_logits - logit_y) / jnp.float32(c - 1) + lse      # "zero-hot" CE

    # TODO(synk): optional per-class `weight` of F.cross_entropy not implemented (default None).
    # TODO(synk): cannot raise RuntimeError on NaN/Inf inside a TPU kernel; guard omitted.
    neg = valid - m                                                # 1. on valid ~mask rows
    s_p = jnp.sum(m * ce_p, axis=0, keepdims=True)                 # (1, 1)
    s_n = jnp.sum(neg * ce_n, axis=0, keepdims=True)               # (1, 1)
    n_neg = jnp.sum(neg, axis=0, keepdims=True)                    # (1, 1)

    lane = jax.lax.broadcasted_iota(jnp.int32, (1, 128), 1)
    row_out = jnp.where(lane == 0, s_p,
              jnp.where(lane == 1, s_n,
              jnp.where(lane == 2, n_neg, jnp.float32(0.0))))      # (1, 128), lane-dense store
    out_ref[0] = row_out


def _choose_block_rows(batch, num_classes, itemsize):
    """Tile rows so the f32 working tile is ~2 MiB (fits v5e 16 MiB / v7x 32 MiB scoped
    VMEM with double buffering), capped at 2048 rows, multiple of 8 sublanes."""
    bytes_per_row = num_classes * max(int(itemsize), 4)
    target = 2 * 1024 * 1024
    rows = max(8, min(2048, target // max(bytes_per_row, 1)))
    rows = max(8, (rows // 8) * 8)
    batch_padded = -(-batch // 8) * 8
    return int(min(rows, batch_padded))


def fi_loss(logits, labels, mask):
    """FILoss forward (weight=None, alpha=None).
    logits: (B, C) float (any float dtype), labels: (B,) int, mask: (B,) bool -> scalar f32."""
    B, C = logits.shape
    labels2d = labels.astype(jnp.int32).reshape(B, 1)
    mask2d = mask.astype(jnp.int32).reshape(B, 1)

    itemsize = jnp.dtype(logits.dtype).itemsize
    tb = _choose_block_rows(B, C, itemsize)
    grid = pl.cdiv(B, tb)

    kernel = functools.partial(_fi_partial_kernel, total_rows=B)

    cost = pl.CostEstimate(
        flops=int(8 * B * C),
        transcendentals=int(B * C),
        bytes_accessed=int(B * C * itemsize + 2 * B * 4 + grid * 128 * 4),
    )

    partials = pl.pallas_call(
        kernel,
        out_shape=jax.ShapeDtypeStruct((grid, 1, 128), jnp.float32),
        grid=(grid,),
        in_specs=[
            pl.BlockSpec((tb, C), lambda i: (i, 0)),
            pl.BlockSpec((tb, 1), lambda i: (i, 0)),
            pl.BlockSpec((tb, 1), lambda i: (i, 0)),
        ],
        out_specs=pl.BlockSpec((1, 1, 128), lambda i: (i, 0, 0)),
        compiler_params=pltpu.CompilerParams(
            dimension_semantics=("parallel",),     # independent per-tile partials
            vmem_limit_bytes=32 * 1024 * 1024,
        ),
        cost_estimate=cost,
    )(logits, labels2d, mask2d)                    # native dtype: no extra f32 HBM copy

    # Tiny finalize in XLA; alpha must use the GLOBAL ~mask count (not per-tile).
    p = partials.reshape(grid, 128)
    s_p = jnp.sum(p[:, 0])
    s_n = jnp.sum(p[:, 1])
    n_neg = jnp.sum(p[:, 2])
    alpha = 1.0 / (1.0 + n_neg)                    # module default; irrelevant when n_neg == 0
    return (s_p + alpha * s_n) / jnp.float32(B)


def _reference_fi_loss(logits, labels, mask):
    """Plain-JAX mirror of the torch code (branch-free equivalent) for checking."""
    B, C = logits.shape
    logits = logits.astype(jnp.float32)
    onehot = jax.nn.one_hot(labels, C, dtype=jnp.float32)
    lse = jax.nn.logsumexp(logits, axis=1)
    logit_y = jnp.sum(logits * onehot, axis=1)
    ce_p = lse - logit_y
    ce_n = -(jnp.sum(logits, axis=1) - logit_y) / (C - 1) + lse
    m = mask.astype(jnp.float32)
    alpha = 1.0 / (1.0 + jnp.sum(1.0 - m))
    return jnp.sum(m * ce_p + (1.0 - m) * alpha * ce_n) / B


if __name__ == "__main__":
    key = jax.random.PRNGKey(0)
    k1, k2, k3 = jax.random.split(key, 3)

    B, C = 8, 16
    logits = jax.random.normal(k1, (B, C), dtype=jnp.float32)
    labels = jax.random.randint(k2, (B,), 0, C, dtype=jnp.int32)
    # mixed mask (some True / some False) -> exercises the general branch
    mask = jax.random.bernoulli(k3, 0.5, (B,))

    loss = fi_loss(logits, labels, mask)
    jax.block_until_ready(loss)

    ref = _reference_fi_loss(logits, labels, mask)
    assert jnp.allclose(loss, ref, atol=1e-5, rtol=1e-5), (loss, ref)

    print("KERNEL_OK")
</pallas_src>

<mosaic_0001>
module attributes {stable_mosaic.version = 11 : i64} {
  func.func @_fi_partial_kernel(%arg0: i32, %arg1: memref<8x16xf32, #tpu.memory_space<vmem>>, %arg2: memref<8x1xi32, #tpu.memory_space<vmem>>, %arg3: memref<8x1xi32, #tpu.memory_space<vmem>>, %arg4: memref<1x1x128xf32, #tpu.memory_space<vmem>>) attributes {dimension_semantics = [#tpu.dimension_semantics<parallel>], iteration_bounds = array<i64: 1>, scalar_prefetch = 0 : i64, scratch_operands = 0 : i64, tpu.core_type = #tpu.core_type<tc>, window_params = [{transform_indices = @transform_0, window_bounds = array<i64: 8, 16>}, {transform_indices = @transform_1, window_bounds = array<i64: 8, 1>}, {transform_indices = @transform_2, window_bounds = array<i64: 8, 1>}, {transform_indices = @transform_3, window_bounds = array<i64: 1, 1, 128>}]} {
    %c0 = arith.constant 0 : index
    %c0_0 = arith.constant 0 : index
    %0 = vector.load %arg1[%c0, %c0_0] : memref<8x16xf32, #tpu.memory_space<vmem>>, vector<8x16xf32>
    %c0_1 = arith.constant 0 : index
    %c0_2 = arith.constant 0 : index
    %1 = vector.load %arg2[%c0_1, %c0_2] : memref<8x1xi32, #tpu.memory_space<vmem>>, vector<8x1xi32>
    %c0_3 = arith.constant 0 : index
    %c0_4 = arith.constant 0 : index
    %2 = vector.load %arg3[%c0_3, %c0_4] : memref<8x1xi32, #tpu.memory_space<vmem>>, vector<8x1xi32>
    %3 = arith.sitofp %2 : vector<8x1xi32> to vector<8x1xf32>
    %cst = arith.constant 1.000000e+00 : f32
    %4 = vector.broadcast %cst : f32 to vector<8x1xf32>
    %5 = tpu.iota {dimensions = array<i32: 1>} : vector<8x16xi32>
    %6 = vector.broadcast %1 : vector<8x1xi32> to vector<8x16xi32>
    %7 = arith.cmpi eq, %5, %6 : vector<8x16xi32>
    %cst_5 = arith.constant 0.000000e+00 : f32
    %8 = vector.broadcast %cst_5 : f32 to vector<8x16xf32>
    %9 = arith.select %7, %0, %8 : vector<8x16xi1>, vector<8x16xf32>
    %cst_6 = arith.constant dense<0.000000e+00> : vector<8xf32>
    %10 = vector.multi_reduction <add>, %9, %cst_6 [1] : vector<8x16xf32> to vector<8xf32>
    %11 = vector.shape_cast %10 : vector<8xf32> to vector<8x1xf32>
    %cst_7 = arith.constant dense<0xFF800000> : vector<8xf32>
    %12 = vector.multi_reduction <maximumf>, %0, %cst_7 [1] : vector<8x16xf32> to vector<8xf32>
    %13 = vector.shape_cast %12 : vector<8xf32> to vector<8x1xf32>
    %14 = vector.broadcast %13 : vector<8x1xf32> to vector<8x16xf32>
    %15 = arith.subf %0, %14 : vector<8x16xf32>
    %16 = math.exp %15 : vector<8x16xf32>
    %cst_8 = arith.constant dense<0.000000e+00> : vector<8xf32>
    %17 = vector.multi_reduction <add>, %16, %cst_8 [1] : vector<8x16xf32> to vector<8xf32>
    %18 = vector.shape_cast %17 : vector<8xf32> to vector<8x1xf32>
    %19 = math.log %18 : vector<8x1xf32>
    %20 = arith.addf %13, %19 : vector<8x1xf32>
    %cst_9 = arith.constant dense<0.000000e+00> : vector<8xf32>
    %21 = vector.multi_reduction <add>, %0, %cst_9 [1] : vector<8x16xf32> to vector<8xf32>
    %22 = vector.shape_cast %21 : vector<8xf32> to vector<8x1xf32>
    %23 = arith.subf %20, %11 : vector<8x1xf32>
    %24 = arith.subf %22, %11 : vector<8x1xf32>
    %cst_10 = arith.constant 0.000000e+00 : f32
    %25 = vector.broadcast %cst_10 : f32 to vector<8x1xf32>
    %26 = arith.subf %25, %24 : vector<8x1xf32>
    %cst_11 = arith.constant 1.500000e+01 : f32
    %27 = vector.broadcast %cst_11 : f32 to vector<8x1xf32>
    %28 = arith.divf %26, %27 : vector<8x1xf32>
    %29 = arith.addf %28, %20 : vector<8x1xf32>
    %30 = arith.subf %4, %3 : vector<8x1xf32>
    %31 = arith.mulf %3, %23 : vector<8x1xf32>
    %cst_12 = arith.constant dense<0.000000e+00> : vector<1xf32>
    %32 = vector.multi_reduction <add>, %31, %cst_12 [0] : vector<8x1xf32> to vector<1xf32>
    %33 = vector.shape_cast %32 : vector<1xf32> to vector<1x1xf32>
    %34 = arith.mulf %30, %29 : vector<8x1xf32>
    %cst_13 = arith.constant dense<0.000000e+00> : vector<1xf32>
    %35 = vector.multi_reduction <add>, %34, %cst_13 [0] : vector<8x1xf32> to vector<1xf32>
    %36 = vector.shape_cast %35 : vector<1xf32> to vector<1x1xf32>
    %cst_14 = arith.constant dense<0.000000e+00> : vector<1xf32>
    %37 = vector.multi_reduction <add>, %30, %cst_14 [0] : vector<8x1xf32> to vector<1xf32>
    %38 = vector.shape_cast %37 : vector<1xf32> to vector<1x1xf32>
    %39 = tpu.iota {dimensions = array<i32: 1>} : vector<1x128xi32>
    %c0_i32 = arith.constant 0 : i32
    %40 = vector.broadcast %c0_i32 : i32 to vector<1x128xi32>
    %41 = arith.cmpi eq, %39, %40 : vector<1x128xi32>
    %c1_i32 = arith.constant 1 : i32
    %42 = vector.broadcast %c1_i32 : i32 to vector<1x128xi32>
    %43 = arith.cmpi eq, %39, %42 : vector<1x128xi32>
    %c2_i32 = arith.constant 2 : i32
    %44 = vector.broadcast %c2_i32 : i32 to vector<1x128xi32>
    %45 = arith.cmpi eq, %39, %44 : vector<1x128xi32>
    %cst_15 = arith.constant 0.000000e+00 : f32
    %46 = vector.shape_cast %38 : vector<1x1xf32> to vector<1x1xf32>
    %47 = vector.broadcast %46 : vector<1x1xf32> to vector<1x128xf32>
    %48 = vector.broadcast %cst_15 : f32 to vector<1x128xf32>
    %49 = arith.select %45, %47, %48 : vector<1x128xi1>, vector<1x128xf32>
    %50 = vector.shape_cast %36 : vector<1x1xf32> to vector<1x1xf32>
    %51 = vector.broadcast %50 : vector<1x1xf32> to vector<1x128xf32>
    %52 = arith.select %43, %51, %49 : vector<1x128xi1>, vector<1x128xf32>
    %53 = vector.shape_cast %33 : vector<1x1xf32> to vector<1x1xf32>
    %54 = vector.broadcast %53 : vector<1x1xf32> to vector<1x128xf32>
    %55 = arith.select %41, %54, %52 : vector<1x128xi1>, vector<1x128xf32>
    %c0_16 = arith.constant 0 : index
    %c0_17 = arith.constant 0 : index
    %c0_18 = arith.constant 0 : index
    %56 = vector.load %arg4[%c0_16, %c0_17, %c0_18] : memref<1x1x128xf32, #tpu.memory_space<vmem>>, vector<1x1x128xf32>
    %57 = vector.shape_cast %56 : vector<1x1x128xf32> to vector<1x128xf32>
    %58 = vector.shape_cast %55 : vector<1x128xf32> to vector<1x1x128xf32>
    tpu.vector_store %arg4[%c0_16, %c0_17, %c0_18], %58 {strides = array<i32>} : memref<1x1x128xf32, #tpu.memory_space<vmem>>, vector<1x1x128xf32>,
    return
  }
  func.func @transform_0(%arg0: i32) -> (i32, i32) {
    %c0_i32 = arith.constant 0 : i32
    %c0_i32_0 = arith.constant 0 : i32
    return %arg0, %c0_i32 : i32, i32
  }
  func.func @transform_1(%arg0: i32) -> (i32, i32) {
    %c0_i32 = arith.constant 0 : i32
    %c0_i32_0 = arith.constant 0 : i32
    return %arg0, %c0_i32 : i32, i32
  }
  func.func @transform_2(%arg0: i32) -> (i32, i32) {
    %c0_i32 = arith.constant 0 : i32
    %c0_i32_0 = arith.constant 0 : i32
    return %arg0, %c0_i32 : i32, i32
  }
  func.func @transform_3(%arg0: i32) -> (i32, i32, i32) {
    %c0_i32 = arith.constant 0 : i32
    %c0_i32_0 = arith.constant 0 : i32
    %c0_i32_1 = arith.constant 0 : i32
    return %arg0, %c0_i32, %c0_i32_0 : i32, i32, i32
  }
}

</mosaic_0001>

<bundles_post_ra>
// kernel: tpu_custom_call.1
= control target key start
LH: loop header
LB: loop body
LE: loop exit
PB: predicated region body
PF: predicated region fallthrough
CT: control target
= control target key end

     0   :  { %vm26_vm0 = vcmask 130048   ;;  %s200_s0 = inlined_call_operand.vmem [shape: f32[8,16], index: 0, kind: input, shape index: {}]   ;;  %s201_s1 = inlined_call_operand.vmem [shape: s32[8,1], index: 1, kind: input, shape index: {}]   ;;  %s202_s2 = inlined_call_operand.vmem [shape: s32[8,1], index: 2, kind: input, shape index: {}]   ;;  %s203_s3 = inlined_call_operand.hbm [shape: f32[1,1,128], index: 3, kind: output, shape index: {}]  }
   0x1   :  { %v15_v0 = vld [vmem:[%s200_s0] sm:$0xff] }
   0x2   :  { %8 = vsyncpa [#allocation3], 0  ;;  %v30_v1 = vsel %vm26_vm0, %v15_v0, -inf  ;;  %v144_v2 = vmov 0   ;;  %v16_v3 = vld [vmem:[%s201_s1] sm:$0xff]  ;;  %v19_v7 = vlaneseq  ;;  %v42_v14 = vsel %vm26_vm0, %v15_v0, 0.0 }
   0x3   :  { %114 = vset.pattern.permute.xlu0 %v144_v2  ;;  %115 = vset.pattern.permute.xlu1 %v144_v2  ;;  %v17_v15 = vld [vmem:[%s202_s2] sm:$0xff]  ;;  %vm53_vm2 = vcmask 7168   ;;  %s145_s2 = smov [#allocation2]  }
   0x4   :  { %31 = vmax.xlane.f32.xlu0 %v30_v1  ;;  %v173_v8 = vand.u32 127, %v19_v7  ;;  %v18_v16 = vcvt.s32.f32 %v17_v15  ;;  %s104_s16 = sshll.u32 %s145_s2, 4  ;;  %s105_s16 = int_to_ptr.vmem [resolvable:$true] %s104_s16 }
   0x5   :  { %s120_s17 = scalar_lea.vmem %s105_s16, 16  ;;  %s124_s18 = scalar_lea.vmem %s105_s16, 32 }
   0x6   :  { %v51_v17 = vsub.f32 1.0, %v18_v16  ;;  %vm78_vm3 = vcmp.eq.s32.totalorder %v173_v8, 2  ;;  %vm77_vm4 = vcmp.eq.s32.totalorder %v173_v8, 1  ;;  %vm76_vm5 = vcmp.eq.s32.totalorder %v173_v8, 0  ;;  %p121_p0 = scmp.ne.s32.totalorder %s105_s16, %s120_s17  ;;  %p125_p1 = scmp.lt.s32.totalorder %s105_s16, %s105_s16 }
   0x7   :  { %p126_p2 = scmp.lt.s32.totalorder %s124_s18, %s120_s17 }
   0x8   :  { %v69_v18 = vsel %vm53_vm2, %v51_v17, 0.0 }
   0x9   :  { %v70_v19 = vrot.slane %v69_v18, 4  ;;  %p127_p3 = por %p126_p2, %p125_p1 }
   0xb   :  { %v71_v20 = vadd.f32 %v70_v19, %v69_v18  ;;  %p128_p4 = pnand %p127_p3, %p121_p0 }
   0xd   :  { %v72_v21 = vrot.slane %v71_v20, 2 }
   0xf   :  { %v73_v22 = vadd.f32 %v72_v21, %v71_v20 }
  0x11   :  { %v74_v23 = vrot.slane %v73_v22, 1 }
  0x13   :  { %v75_v24 = vadd.f32 %v74_v23, %v73_v22 }
  0x1a   :  { %22 = vperm.xlu0 %114, %v16_v3  }
  0x91   :  { %v32_v4 = vpop.xlane.xlu0 %31 }
  0x92   :  { %v33_v5 = vsub.f32 %v15_v0, %v32_v4 }
  0x94   :  { %v34_v6 = vmul.f32 1.442695, %v33_v5 }
  0x96   :  { %116 = vpow2.f32 %v34_v6 }
  0x99   :  { %v23_v9 = vpop.permute.xlu0 %22 }
  0x9a   :  { %vm24_vm1 = vcmp.eq.s32.totalorder %v173_v8, %v23_v9 }
  0x9b   :  { %v25_v11 = vsel %vm24_vm1, %v15_v0, 0.0 }
  0x9c   :  { %v27_v13 = vsel %vm26_vm0, %v25_v11, 0.0 }
  0xa0   :  { %v117_v10 = vpop.eup %116 }
  0xa1   :  { %v36_v12 = vsel %vm26_vm0, %v117_v10, 0.0 }
  0xa2   :  { %37 = vadd.xlane.f32.xlu1 %v36_v12 }
  0xa6   :  { %28 = vadd.xlane.f32.xlu1 %v27_v13 }
  0xaa   :  { %43 = vadd.xlane.f32.xlu1 %v42_v14 }
  0xbb   :  { %81 = vperm.xlu1 %115, %v75_v24  }
 0x12f   :  { %v38_v25 = vpop.xlane.xlu1 %37 }
 0x130   :  { %118 = vlog2.f32 %v38_v25 }
 0x133   :  { %v29_v26 = vpop.xlane.xlu1 %28 }
 0x137   :  { %v44_v27 = vpop.xlane.xlu1 %43 }
 0x138   :  { %v46_v28 = vsub.f32 %v44_v27, %v29_v26 }
 0x13a   :  { %v119_v29 = vpop.eup %118  ;;  %v47_v30 = vsub.f32 0.0, %v46_v28 }
 0x13b   :  { %v40_v31 = vmul.f32 0.6931472, %v119_v29  ;;  %v82_v52 = vpop.permute.xlu1 %81 }
 0x13c   :  { %v49_v32 = vmul.f32 0.06666667, %v47_v30  ;;  %v84_v54 = vsel %vm78_vm3, %v82_v52, 0.0 }
 0x13d   :  { %v41_v33 = vadd.f32 %v40_v31, %v32_v4 }
 0x13f   :  { %v45_v34 = vsub.f32 %v41_v33, %v29_v26  ;;  %v50_v35 = vadd.f32 %v49_v32, %v41_v33 }
 0x141   :  { %v52_v36 = vmul.f32 %v45_v34, %v18_v16  ;;  %v61_v37 = vmul.f32 %v51_v17, %v50_v35 }
 0x143   :  { %v54_v38 = vsel %vm53_vm2, %v52_v36, 0.0  ;;  %v62_v39 = vsel %vm53_vm2, %v61_v37, 0.0 }
 0x144   :  { %v55_v40 = vrot.slane %v54_v38, 4  ;;  %v63_v41 = vrot.slane %v62_v39, 4 }
 0x146   :  { %v56_v42 = vadd.f32 %v55_v40, %v54_v38  ;;  %v64_v43 = vadd.f32 %v63_v41, %v62_v39 }
 0x148   :  { %v65_v44 = vrot.slane %v64_v43, 2  ;;  %v57_v45 = vrot.slane %v56_v42, 2 }
 0x14a   :  { %v66_v46 = vadd.f32 %v65_v44, %v64_v43  ;;  %v58_v47 = vadd.f32 %v57_v45, %v56_v42 }
 0x14c   :  { %v67_v48 = vrot.slane %v66_v46, 1  ;;  %v59_v50 = vrot.slane %v58_v47, 1 }
 0x14e   :  { %v68_v49 = vadd.f32 %v67_v48, %v66_v46  ;;  %v60_v51 = vadd.f32 %v59_v50, %v58_v47 }
 0x150   :  { %87 = vperm.xlu1 %115, %v68_v49  }
 0x154   :  { %93 = vperm.xlu1 %115, %v60_v51  }
 0x1cf   :  { %v88_v53 = vpop.permute.xlu1 %87 }
 0x1d0   :  { %v90_v55 = vsel %vm77_vm4, %v88_v53, %v84_v54 }
 0x1d3   :  { %v94_v56 = vpop.permute.xlu1 %93 }
 0x1d4   :  { %v96_v57 = vsel %vm76_vm5, %v94_v56, %v90_v55 }
 0x1d5   :  { %97 = vst [vmem:[#allocation2] sm:$0x1] %v96_v57 }
 0x1d6   :  { %131 = shalt.err (!%p128_p4)
}
 0x1d7   :  { %s132_s21 = scalar_lea.hbm %s203_s3, 16 }
 0x1d8   :  { %p133_p5 = scmp.ne.s32.totalorder %s203_s3, %s132_s21  ;;  %p136_p6 = scmp.lt.u32.totalorder %s132_s21, %s203_s3 }
 0x1da   :  { %p138_p7 = pnand %p136_p6, %p133_p5 }
 0x1dc   :  { %141 = shalt.err (!%p138_p7)
}
 0x1dd   :  { %107 = dma.vmem_to_hbm [thread:$0]  %s105_s16, 16, %s203_s3, [#allocation3]  }
 0x1de   :  { %142 = dma.done.wait [#allocation3], 16  }
 0x1df   :  { %143 = vsyncadd [#allocation3], 4294967280 }
 0x1e0   :  { %111 = vsyncpa [#allocation3], 1 }

</bundles_post_ra>
